<compile_context>
chip_gen: v7x
topology: tpu7x:2x2x1
jax: 0.10.0
libtpu: 0.0.40
codegen_flags: <defaults>
</compile_context>

<pallas_src>
import functools

import jax
import jax.numpy as jnp
from jax.experimental import pallas as pl
from jax.experimental.pallas import tpu as pltpu


# ----------------------------- sizing helpers -----------------------------

def _vmem_budget_bytes():
    """~Half of physical VMEM: 64 MiB on v5e/v6e (128 MiB phys), 32 MiB on v7x."""
    cap = 128 << 20
    try:
        cap = int(pltpu.get_tpu_info().vmem_capacity_bytes)
    except Exception:
        pass
    return cap // 2


def _pick_block_l(seq_len, channels, itemsize, target_bytes=4 << 20):
    """Row tile: full L if the slab is small, else an ~target_bytes, 8-aligned
    tile, preferring one that divides L so the tail mask is never needed."""
    if seq_len * channels * itemsize <= target_bytes:
        return seq_len
    bl = (target_bytes // (channels * itemsize)) // 8 * 8
    bl = int(max(8, min(bl, seq_len)))
    for cand in range(bl, max(8, bl - 512) - 1, -8):
        if seq_len % cand == 0:
            return cand
    return bl


# ----------------------------- Pallas kernels -----------------------------

def _se_fused_kernel(x_ref, w1_ref, w2_ref, o_ref, *, seq_len):
    """Per-batch slab resident in VMEM: pool + FC gate + scale, one HBM pass.

    x_ref/o_ref: (L, C); w1: (C, H); w2: (H, C)."""
    x = x_ref[...]                                          # (L, C), native dtype
    xf = x.astype(jnp.float32)
    if seq_len % 8 == 0:
        # Partial (8, C) reduction first: VPU vreg adds, single XLU collapse.
        part = jnp.sum(xf.reshape(seq_len // 8, 8, xf.shape[-1]), axis=0)
        total = jnp.sum(part, axis=0, keepdims=True)        # (1, C)
    else:
        total = jnp.sum(xf, axis=0, keepdims=True)
    mean = total * (1.0 / seq_len)                          # (1, C)
    h = jnp.maximum(
        jnp.dot(mean, w1_ref[...].astype(jnp.float32),
                preferred_element_type=jnp.float32), 0.0)   # (1, H), ReLU
    z = jnp.dot(h, w2_ref[...].astype(jnp.float32),
                preferred_element_type=jnp.float32)         # (1, C)
    gate = (1.0 / (1.0 + jnp.exp(-z))).astype(x.dtype)      # sigmoid, (1, C)
    o_ref[...] = x * gate                                   # broadcast over rows


def _se_gate_kernel(x_ref, w1_ref, w2_ref, gate_ref, acc_ref, *, seq_len, block_l):
    """Streaming pool + gate.  x_ref: (bl, C); gate_ref: (1, C); acc: (rows, C) f32."""
    l = pl.program_id(1)

    @pl.when(l == 0)
    def _():
        acc_ref[...] = jnp.zeros_like(acc_ref)

    x = x_ref[...].astype(jnp.float32)                      # (bl, C)
    if seq_len % block_l != 0:
        # Only compiled in when the tile does not divide L (rare; _pick_block_l
        # avoids it).  Non-last tiles see an all-true predicate.
        is_last = l == pl.num_programs(1) - 1
        row = l * block_l + jax.lax.broadcasted_iota(jnp.int32, x.shape, 0)
        keep = jnp.logical_or(jnp.logical_not(is_last), row < seq_len)
        x = jnp.where(keep, x, 0.0)

    if block_l % 8 == 0:
        # (8, C) partial accumulation: pure VPU adds, no per-tile XLU reduction.
        acc_ref[...] += jnp.sum(x.reshape(block_l // 8, 8, x.shape[-1]), axis=0)
    else:
        acc_ref[...] += jnp.sum(x, axis=0, keepdims=True)

    @pl.when(l == pl.num_programs(1) - 1)
    def _():
        total = jnp.sum(acc_ref[...], axis=0, keepdims=True)  # single collapse
        mean = total * (1.0 / seq_len)                         # (1, C)
        h = jnp.maximum(
            jnp.dot(mean, w1_ref[...].astype(jnp.float32),
                    preferred_element_type=jnp.float32), 0.0)  # (1, H)
        z = jnp.dot(h, w2_ref[...].astype(jnp.float32),
                    preferred_element_type=jnp.float32)        # (1, C)
        gate_ref[...] = (1.0 / (1.0 + jnp.exp(-z))).astype(gate_ref.dtype)


def _se_scale_kernel(x_ref, gate_ref, o_ref):
    """x_ref/o_ref: (bl, C); gate_ref: (1, C).  Multiply in the native dtype."""
    o_ref[...] = x_ref[...] * gate_ref[...]


# ----------------------------- wrapper -----------------------------

def se_layer(x, w1, w2, *, force_two_pass=False):
    """SELayer forward. x: (B, L, C); w1: (C, H); w2: (H, C). Returns (B, L, C)."""
    B, L, C = x.shape
    H = w1.shape[1]
    itemsize = jnp.dtype(x.dtype).itemsize
    budget = _vmem_budget_bytes()
    slab_bytes = L * C * itemsize
    w_bytes = (C * H + H * C) * 4

    # ---------- fused single-pass variant (x[b] resident in VMEM) ----------
    # Working set ~ 2 input bufs + 2 output bufs + 1 temp ≈ 5 * slab.
    if not force_two_pass and 5 * slab_bytes + 4 * w_bytes <= budget:
        cost = pl.CostEstimate(
            flops=int(B * (2 * L * C + 4 * C * H)),
            transcendentals=int(B * C),
            bytes_accessed=int(2 * B * L * C * itemsize + 2 * w_bytes),
        )
        # TODO(synk): on v7x with B == 1 a (B,)-only grid leaves one TensorCore
        # idle; split the L reduction across cores if that ever matters.
        return pl.pallas_call(
            functools.partial(_se_fused_kernel, seq_len=L),
            out_shape=jax.ShapeDtypeStruct((B, L, C), x.dtype),
            grid=(B,),
            in_specs=[
                pl.BlockSpec((None, L, C), lambda b: (b, 0, 0)),
                pl.BlockSpec((C, H), lambda b: (0, 0)),
                pl.BlockSpec((H, C), lambda b: (0, 0)),
            ],
            out_specs=pl.BlockSpec((None, L, C), lambda b: (b, 0, 0)),
            compiler_params=pltpu.CompilerParams(
                dimension_semantics=("parallel",),
                vmem_limit_bytes=budget),
            cost_estimate=cost,
        )(x, w1, w2)

    # ---------- streaming two-pass fallback (large L) ----------
    bl = _pick_block_l(L, C, itemsize)
    nl = pl.cdiv(L, bl)
    acc_rows = 8 if bl % 8 == 0 else 1

    gate_cost = pl.CostEstimate(
        flops=int(B * (L * C + 4 * C * H)),
        transcendentals=int(B * C),
        bytes_accessed=int(B * L * C * itemsize + B * C * itemsize + 2 * w_bytes),
    )
    gate = pl.pallas_call(
        functools.partial(_se_gate_kernel, seq_len=L, block_l=bl),
        out_shape=jax.ShapeDtypeStruct((B, 1, C), x.dtype),
        grid=(B, nl),
        in_specs=[
            pl.BlockSpec((None, bl, C), lambda b, l: (b, l, 0)),
            pl.BlockSpec((C, H), lambda b, l: (0, 0)),
            pl.BlockSpec((H, C), lambda b, l: (0, 0)),
        ],
        out_specs=pl.BlockSpec((None, 1, C), lambda b, l: (b, 0, 0)),
        scratch_shapes=[pltpu.VMEM((acc_rows, C), jnp.float32)],
        compiler_params=pltpu.CompilerParams(
            dimension_semantics=("parallel", "arbitrary"),
            vmem_limit_bytes=budget),
        cost_estimate=gate_cost,
    )(x, w1, w2)

    scale_cost = pl.CostEstimate(
        flops=int(B * L * C),
        transcendentals=0,
        bytes_accessed=int(2 * B * L * C * itemsize + B * C * itemsize),
    )
    out = pl.pallas_call(
        _se_scale_kernel,
        out_shape=jax.ShapeDtypeStruct((B, L, C), x.dtype),
        grid=(B, nl),
        in_specs=[
            pl.BlockSpec((None, bl, C), lambda b, l: (b, l, 0)),
            pl.BlockSpec((None, 1, C), lambda b, l: (b, 0, 0)),
        ],
        out_specs=pl.BlockSpec((None, bl, C), lambda b, l: (b, l, 0)),
        compiler_params=pltpu.CompilerParams(
            dimension_semantics=("parallel", "parallel"),
            vmem_limit_bytes=budget),
        cost_estimate=scale_cost,
    )(x, gate)
    return out


# ----------------------------- reference & main -----------------------------

def se_layer_ref(x, w1, w2):
    mean = jnp.mean(x.astype(jnp.float32), axis=1)               # (B, C)
    h = jnp.maximum(mean @ w1, 0.0)
    gate = jax.nn.sigmoid(h @ w2)                                # (B, C)
    return (x.astype(jnp.float32) * gate[:, None, :]).astype(x.dtype)


if __name__ == "__main__":
    # channel=128 (lane-dense), reduction=16 -> hidden=8, seq len L=128, batch=2.
    B, L, C, R = 2, 128, 128, 16
    H = C // R

    key = jax.random.PRNGKey(0)
    kx, k1, k2 = jax.random.split(key, 3)
    x = jax.random.normal(kx, (B, L, C), jnp.float32)
    # nn.Linear weights stored pre-transposed as (in, out) for right-multiplication.
    w1 = jax.random.normal(k1, (C, H), jnp.float32) * (1.0 / (C ** 0.5))
    w2 = jax.random.normal(k2, (H, C), jnp.float32) * (1.0 / (H ** 0.5))

    ref = se_layer_ref(x, w1, w2)

    # Fused single-pass path (taken for these shapes).
    fwd = jax.jit(se_layer)
    out = jax.block_until_ready(fwd(x, w1, w2))
    assert out.shape == (B, L, C), out.shape
    assert bool(jnp.all(jnp.isfinite(out)))
    err = float(jnp.max(jnp.abs(out - ref)))
    assert err < 1e-5, f"fused max abs error {err}"

    # Also exercise the streaming two-pass fallback (used when L*C is too big
    # for a VMEM-resident slab).
    fwd2 = jax.jit(functools.partial(se_layer, force_two_pass=True))
    out2 = jax.block_until_ready(fwd2(x, w1, w2))
    err2 = float(jnp.max(jnp.abs(out2 - ref)))
    assert err2 < 1e-5, f"two-pass max abs error {err2}"

    print("KERNEL_OK")
</pallas_src>

<mosaic_0001>
module attributes {stable_mosaic.version = 11 : i64} {
  func.func @_se_fused_kernel(%arg0: i32, %arg1: memref<1x128x128xf32, #tpu.memory_space<vmem>>, %arg2: memref<128x8xf32, #tpu.memory_space<vmem>>, %arg3: memref<8x128xf32, #tpu.memory_space<vmem>>, %arg4: memref<1x128x128xf32, #tpu.memory_space<vmem>>) attributes {dimension_semantics = [#tpu.dimension_semantics<parallel>], iteration_bounds = array<i64: 2>, scalar_prefetch = 0 : i64, scratch_operands = 0 : i64, tpu.core_type = #tpu.core_type<tc>, window_params = [{transform_indices = @transform_0, window_bounds = array<i64: 1, 128, 128>}, {pipeline_mode = #tpu.pipeline_mode<synchronous>, transform_indices = @transform_1, window_bounds = array<i64: 128, 8>}, {pipeline_mode = #tpu.pipeline_mode<synchronous>, transform_indices = @transform_2, window_bounds = array<i64: 8, 128>}, {transform_indices = @transform_3, window_bounds = array<i64: 1, 128, 128>}]} {
    %c0 = arith.constant 0 : index
    %c0_0 = arith.constant 0 : index
    %c0_1 = arith.constant 0 : index
    %0 = vector.load %arg1[%c0, %c0_0, %c0_1] : memref<1x128x128xf32, #tpu.memory_space<vmem>>, vector<1x128x128xf32>
    %1 = vector.shape_cast %0 : vector<1x128x128xf32> to vector<128x128xf32>
    %2 = vector.shape_cast %1 : vector<128x128xf32> to vector<16x8x128xf32>
    %cst = arith.constant dense<0.000000e+00> : vector<8x128xf32>
    %3 = vector.multi_reduction <add>, %2, %cst [0] : vector<16x8x128xf32> to vector<8x128xf32>
    %cst_2 = arith.constant dense<0.000000e+00> : vector<128xf32>
    %4 = vector.multi_reduction <add>, %3, %cst_2 [0] : vector<8x128xf32> to vector<128xf32>
    %5 = vector.shape_cast %4 : vector<128xf32> to vector<1x128xf32>
    %cst_3 = arith.constant 7.812500e-03 : f32
    %6 = vector.broadcast %cst_3 : f32 to vector<1x128xf32>
    %7 = arith.mulf %5, %6 : vector<1x128xf32>
    %c0_4 = arith.constant 0 : index
    %c0_5 = arith.constant 0 : index
    %8 = vector.load %arg2[%c0_4, %c0_5] : memref<128x8xf32, #tpu.memory_space<vmem>>, vector<128x8xf32>
    %cst_6 = arith.constant dense<0.000000e+00> : vector<1x8xf32>
    %9 = tpu.matmul %7, %8, %cst_6 {dimension_numbers = #tpu.dot_dimension_numbers<[1], [0], [0], [1], [0, 0, 1, 1], [], []>} : vector<1x128xf32>, vector<128x8xf32>, vector<1x8xf32> -> vector<1x8xf32>
    %cst_7 = arith.constant 0.000000e+00 : f32
    %10 = vector.broadcast %cst_7 : f32 to vector<1x8xf32>
    %11 = arith.maximumf %9, %10 : vector<1x8xf32>
    %c0_8 = arith.constant 0 : index
    %c0_9 = arith.constant 0 : index
    %12 = vector.load %arg3[%c0_8, %c0_9] : memref<8x128xf32, #tpu.memory_space<vmem>>, vector<8x128xf32>
    %cst_10 = arith.constant dense<0.000000e+00> : vector<1x128xf32>
    %13 = tpu.matmul %11, %12, %cst_10 {dimension_numbers = #tpu.dot_dimension_numbers<[1], [0], [0], [1], [0, 0, 1, 1], [], []>} : vector<1x8xf32>, vector<8x128xf32>, vector<1x128xf32> -> vector<1x128xf32>
    %cst_11 = arith.constant 0.000000e+00 : f32
    %14 = vector.broadcast %cst_11 : f32 to vector<1x128xf32>
    %15 = arith.subf %14, %13 : vector<1x128xf32>
    %16 = math.exp %15 : vector<1x128xf32>
    %cst_12 = arith.constant 1.000000e+00 : f32
    %17 = vector.broadcast %cst_12 : f32 to vector<1x128xf32>
    %18 = arith.addf %17, %16 : vector<1x128xf32>
    %cst_13 = arith.constant 1.000000e+00 : f32
    %19 = vector.broadcast %cst_13 : f32 to vector<1x128xf32>
    %20 = arith.divf %19, %18 : vector<1x128xf32>
    %21 = vector.broadcast %20 : vector<1x128xf32> to vector<128x128xf32>
    %22 = arith.mulf %1, %21 : vector<128x128xf32>
    %c0_14 = arith.constant 0 : index
    %c0_15 = arith.constant 0 : index
    %c0_16 = arith.constant 0 : index
    %23 = vector.load %arg4[%c0_14, %c0_15, %c0_16] : memref<1x128x128xf32, #tpu.memory_space<vmem>>, vector<1x128x128xf32>
    %24 = vector.shape_cast %23 : vector<1x128x128xf32> to vector<128x128xf32>
    %25 = vector.shape_cast %22 : vector<128x128xf32> to vector<1x128x128xf32>
    tpu.vector_store %arg4[%c0_14, %c0_15, %c0_16], %25 {strides = array<i32>} : memref<1x128x128xf32, #tpu.memory_space<vmem>>, vector<1x128x128xf32>,
    return
  }
  func.func @transform_0(%arg0: i32) -> (i32, i32, i32) {
    %c0_i32 = arith.constant 0 : i32
    %c0_i32_0 = arith.constant 0 : i32
    %c0_i32_1 = arith.constant 0 : i32
    return %arg0, %c0_i32, %c0_i32_0 : i32, i32, i32
  }
  func.func @transform_1(%arg0: i32) -> (i32, i32) {
    %c0_i32 = arith.constant 0 : i32
    %c0_i32_0 = arith.constant 0 : i32
    %c0_i32_1 = arith.constant 0 : i32
    return %c0_i32, %c0_i32_0 : i32, i32
  }
  func.func @transform_2(%arg0: i32) -> (i32, i32) {
    %c0_i32 = arith.constant 0 : i32
    %c0_i32_0 = arith.constant 0 : i32
    %c0_i32_1 = arith.constant 0 : i32
    return %c0_i32, %c0_i32_0 : i32, i32
  }
  func.func @transform_3(%arg0: i32) -> (i32, i32, i32) {
    %c0_i32 = arith.constant 0 : i32
    %c0_i32_0 = arith.constant 0 : i32
    %c0_i32_1 = arith.constant 0 : i32
    return %arg0, %c0_i32, %c0_i32_0 : i32, i32, i32
  }
}

</mosaic_0001>

<bundles_post_ra>
// kernel: se_layer.1
= control target key start
LH: loop header
LB: loop body
LE: loop exit
PB: predicated region body
PF: predicated region fallthrough
CT: control target
= control target key end

     0   :  { %8 = vsyncpa [#allocation3], 0  ;;  %s1268_s0 = inlined_call_operand.hbm [shape: f32[2,128,128], index: 0, kind: input, shape index: {}]   ;;  %s1269_s1 = inlined_call_operand.hbm [shape: f32[128,8], index: 1, kind: input, shape index: {}]   ;;  %s1270_s2 = inlined_call_operand.hbm [shape: f32[8,128], index: 2, kind: input, shape index: {}]   ;;  %s1271_s3 = inlined_call_operand.hbm [shape: f32[2,128,128], index: 3, kind: output, shape index: {}]  }
   0x1   :  { %10 = vsyncpa [#allocation3 + $0x1], 0 }
   0x2   :  { %11 = vsyncpa [#allocation6], 0 }
   0x3   :  { %12 = vsyncpa [#allocation4], 0 }
   0x4   :  { %14 = vsyncpa [#allocation4 + $0x1], 0  ;;  %s935_s12 = smov 0   ;;  %s937_s13 = smov 0  }
   0x5   :  { %s939_s14 = smov 0   ;;  %s941_s15 = smov 0  }
   0x6 LB: > { %s956_s16 = sadd.s32 4294967295, %s902_s15   ;;  %s564_s17 = sadd.s32 4294967294, %s902_s15   ;;  %s902_s15 = sphi %s941_s15, %s1291_s15   ;;  %s898_s14 = sphi %s939_s14, %s1290_s14   ;;  %s894_s13 = sphi %s937_s13, %s1289_s13   ;;  %s890_s12 = sphi %s935_s12, %s1288_s12  }
   0x7   : > { %p40_p0 = scmp.ne.s32.totalorder %s894_s13, %s890_s12  ;;  %p1272_p1 = scmp.eq.s32.totalorder %s956_s16, 0 }
   0x8   : > { %p112_p3 = scmp.eq.s32.totalorder %s564_s17, 1  ;;  %p565_p5 = scmp.ge.s32.totalorder %s902_s15, 1 }
   0x9   : > { %p965_p4 = por %p1272_p1, %p40_p0  ;;  %p119_p7 = scmp.lt.s32.totalorder %s902_s15, 3 }
   0xa   : > { %p970_p6 = por %p112_p3, %p40_p0  ;;  %s904_s21 = smov [#allocation5]  }
   0xb   : > { %s1275_s18 = scalar_select %p965_p4, 1, 0 }
   0xc   : > { %s1276_s19 = scalar_select %p970_p6, 1, 0 }
   0xd   : > { %p975_p8 = pnand %p565_p5, %p119_p7  ;;  %s131_s22 = sshll.u32 %s904_s21, 4  ;;  %s979_s22 = int_to_ptr.vmem [resolvable:$true] %s131_s22 }
   0xe   : > { %s905_s24 = smov [#allocation7]   ;;  %s746_s28 = scalar_lea.hbm %s1269_s1, 2048 }
   0xf   : > { %p680_p9 = pneg %p975_p8  ;;  %s145_s25 = sshll.u32 %s905_s24, 4  ;;  %s990_s25 = int_to_ptr.vmem [resolvable:$true] %s145_s25 }
  0x10   : > { %p747_p12 = scmp.ne.s32.totalorder %s1269_s1, %s746_s28  ;;  %p753_p5 = scmp.lt.u32.totalorder %s746_s28, %s1269_s1 }
  0x11   : > { %p986_p11 = pnand %p680_p9, %p1272_p1 }
  0x13   : > { %p748_p13 = pneg %p986_p11 }
  0x15   : > { %p749_p0 = pnand %p748_p13, %p747_p12 }
  0x17   : > { %p750_p3 = pneg %p749_p0 }
  0x19   : > { %p755_p7 = pnand %p753_p5, %p750_p3 }
  0x1b   : > { %758 = shalt.err (!%p755_p7)
}
  0x1c   : > { %s759_s6 = scalar_lea.vmem %s979_s22, 2048  ;;  %p767_p2 = scmp.lt.s32.totalorder %s979_s22, %s979_s22 }
  0x1d   : > { %p760_p9 = scmp.ne.s32.totalorder %s979_s22, %s759_s6  ;;  %p768_p12 = scmp.lt.s32.totalorder %s759_s6, %s759_s6 }
  0x1f   : > { %p762_p10 = pnand %p760_p9, %p748_p13  ;;  %p769_p0 = por %p768_p12, %p767_p2 }
  0x21   : > { %p763_p1 = pneg %p762_p10 }
  0x23   : > { %p770_p6 = pnand %p769_p0, %p763_p1 }
  0x25   : > { %773 = shalt.err (!%p770_p6)
}
  0x26   : > { %s906_s7 = smov 128   ;;  %s907_s8 = smov 8  }
  0x27   : > { %683 = dma.hbm_to_vmem [thread:$0]  (!%p986_p11), %s1269_s1, 2048, %s979_s22, [#allocation6], %s906_s7, %s906_s7, %s907_s8  }
  0x28   : > { %s774_s21 = scalar_lea.hbm %s1270_s2, 128 }
  0x29   : > { %p775_p1 = scmp.ne.s32.totalorder %s1270_s2, %s774_s21  ;;  %p781_p10 = scmp.lt.u32.totalorder %s774_s21, %s1270_s2 }
  0x2b   : > { %p777_p2 = pnand %p775_p1, %p748_p13 }
  0x2d   : > { %p778_p6 = pneg %p777_p2 }
  0x2f   : > { %p783_p3 = pnand %p781_p10, %p778_p6 }
  0x31   : > { %786 = shalt.err (!%p783_p3)
}
  0x32   : > { %s787_s22 = scalar_lea.vmem %s990_s25, 128  ;;  %p795_p12 = scmp.lt.s32.totalorder %s990_s25, %s990_s25 }
  0x33   : > { %p788_p5 = scmp.ne.s32.totalorder %s990_s25, %s787_s22  ;;  %p796_p0 = scmp.lt.s32.totalorder %s787_s22, %s787_s22 }
  0x35   : > { %p790_p7 = pnand %p788_p5, %p748_p13  ;;  %p797_p1 = por %p796_p0, %p795_p12 }
  0x37   : > { %p791_p9 = pneg %p790_p7 }
  0x39   : > { %p798_p2 = pnand %p797_p1, %p791_p9 }
  0x3b   : > { %801 = shalt.err (!%p798_p2)
}
  0x3c   : > { %686 = dma.hbm_to_vmem [thread:$0]  (!%p986_p11), %s1270_s2, 128, %s990_s25, [#allocation6]  }
  0x3d   : > { %s1048_s4 = sadd.s32 1, %s902_s15   ;;  %s27_s23 = sadd.s32 1, %s898_s14 }
  0x3e   : > { %s24_s5 = ssub.s32 %s902_s15, %s1048_s4  ;;  %p34_p13 = scmp.ne.s32.totalorder %s898_s14, %s894_s13 }
  0x3f   : > { %p25_p6 = scmp.eq.s32.totalorder %s24_s5, 0  ;;  %p35_p10 = scmp.eq.s32.totalorder %s902_s15, 0 }
  0x40   : > { %p1279_p3 = scmp.eq.s32.totalorder %s956_s16, 1  ;;  %p697_p7 = scmp.lt.s32.totalorder %s902_s15, 2 }
  0x41   : > { %s1064_s9 = scalar_select %p25_p6, %s898_s14, %s27_s23  }
  0x42   : > { %p1058_p5 = por %p1279_p3, %p34_p13  ;;  %p36_p9 = por %p35_p10, %p34_p13 }
  0x43   : > { %s156_s10 = sand.u32 1, %s898_s14   ;;  %s583_s25 = sshll.u32 %s902_s15, 11 }
  0x44   : > { %s1280_s6 = scalar_select %p1058_p5, 1, 0 }
  0x45   : > { %s569_s11 = sshll.u32 %s156_s10, 7  ;;  %s1071_s24 = scalar_lea.hbm %s1268_s0, %s583_s25 }
  0x46   : > { %s160_s26 = scalar_lea.vmem [#allocation2], %s569_s11  ;;  %p1075_p11 = pnand %p697_p7, %p36_p9 }
  0x47   : > { %s167_s27 = sshll.u32 %s160_s26, 4  ;;  %s1079_s22 = scalar_lea.sflag [#allocation3], %s156_s10  ;;  %s1073_s27 = int_to_ptr.vmem [resolvable:$true] %s167_s27 }
  0x48   : > { %s802_s29 = scalar_lea.hbm %s1071_s24, 2048  ;;  %p804_p0 = pneg %p1075_p11 }
  0x49   : > { %p803_p12 = scmp.ne.s32.totalorder %s1071_s24, %s802_s29  ;;  %s807_s5 = scalar_lea.hbm %s1268_s0, 4096 }
  0x4a   : > { %p808_p13 = scmp.lt.u32.totalorder %s1071_s24, %s1268_s0  ;;  %p809_p6 = scmp.lt.u32.totalorder %s807_s5, %s802_s29 }
  0x4b   : > { %p805_p1 = pnand %p804_p0, %p803_p12  ;;  %p811_p3 = scmp.lt.u32.totalorder %s802_s29, %s1071_s24 }
  0x4c   : > { %p810_p10 = por %p809_p6, %p808_p13 }
  0x4d   : > { %p806_p2 = pneg %p805_p1 }
  0x4e   : > { %p812_p7 = por %p811_p3, %p810_p10 }
  0x50   : > { %p813_p9 = pnand %p812_p7, %p806_p2 }
  0x52   : > { %816 = shalt.err (!%p813_p9)
}
  0x53   : > { %s817_s10 = scalar_lea.vmem %s1073_s27, 2048  ;;  %s908_s17 = smov [#allocation2]  }
  0x54   : > { %p818_p12 = scmp.ne.s32.totalorder %s1073_s27, %s817_s10  ;;  %s822_s21 = sshll.u32 %s908_s17, 4  ;;  %s823_s21 = int_to_ptr.vmem [resolvable:$false] %s822_s21 }
  0x55   : > { %s824_s26 = scalar_lea.vmem %s823_s21, 4096  ;;  %p825_p4 = scmp.lt.s32.totalorder %s1073_s27, %s823_s21 }
  0x56   : > { %p820_p1 = pnand %p818_p12, %p804_p0  ;;  %p826_p13 = scmp.lt.s32.totalorder %s824_s26, %s817_s10 }
  0x58   : > { %p821_p5 = pneg %p820_p1  ;;  %p827_p6 = por %p826_p13, %p825_p4 }
  0x5a   : > { %p828_p10 = pnand %p827_p6, %p821_p5 }
  0x5c   : > { %831 = shalt.err (!%p828_p10)
}
  0x5d   : > { %690 = dma.hbm_to_vmem [thread:$0]  (!%p1075_p11), %s1071_s24, 2048, %s1073_s27, %s1079_s22, %s906_s7, %s906_s7, %s907_s8  }
  0x5e   : > { %179 = sbr.rel (%p975_p8) target bundleno = 634 (0x27a), region = 32  ;;  %s1113_s29 = sand.u32 (!%p975_p8), 1, %s894_s13  }
  0x5f   : > { %s573_s30 = sshll.u32 (!%p975_p8), %s1113_s29, 7  ;;  %s182_s23 = scalar_lea.sflag (!%p975_p8), [#allocation3], %s1113_s29 }
  0x60   : > { %s1119_s28 = scalar_lea.vmem (!%p975_p8), [#allocation2], %s573_s30  ;;  %p1282_p4 = scmp.ne.s32.totalorder (!%p975_p8), %s1275_s18, 0 }
  0x65   : > { %877 = dma.done.wait (%p1282_p4), %s182_s23, 2048  }
  0x66   : > { %879 = vsyncadd (%p1282_p4), %s182_s23, 4294965248  ;;  %p1283_p5 = scmp.eq.s32.totalorder %s956_s16, 0 }
  0x68   : > { %881 = dma.done.wait (%p1283_p5), [#allocation6], 2176   ;;  %p1284_p8 = pmov %p1283_p5 }
  0x69   : > { %v909_v0 = vmov 0.0|0.0   ;;  %vm910_vm0 = vmmov 0   ;;  %v911_v1 = vmov 0.0   ;;  %v254_v2 = vld [vmem:[#allocation5] sm:$0xff]  ;;  %v255_v3 = vld [vmem:[#allocation5 + $0x8] sm:$0xff]  ;;  %v256_v4 = vld [vmem:[#allocation5 + $0x10] sm:$0xff] }
  0x6a   : > { %883 = vsyncadd (%p1284_p8), [#allocation6], 4294965120  ;;  %644 = vmatprep.subr.bf16.mxu0 %v909_v0  ;;  %636 = vmatprep.mubr.msk.f32.mxu0 %vm910_vm0, %v911_v1  ;;  %v645_v5 = vpack.c.bf16 %v255_v3, %v254_v2  ;;  %v257_v6 = vld [vmem:[#allocation5 + $0x18] sm:$0xff]  ;;  %v258_v8 = vld [vmem:[#allocation5 + $0x20] sm:$0xff]  ;;  %vm342_vm1 = vcmask 64512   ;;  %s584_s18 = sshll.u32 %s956_s16, 11 }
  0x6b   : > { %639 = vmatprep.subr.mxu1 %v911_v1  ;;  %641 = vmatprep.mubr.msk.f32.mxu1 %vm910_vm0, %v911_v1  ;;  %v648_v7 = vpack.c.bf16 %v257_v6, %v256_v4  ;;  %v259_v9 = vld [vmem:[#allocation5 + $0x28] sm:$0xff]  ;;  %v1132_v10 = vld [vmem:[%s1119_s28] sm:$0xff]  ;;  %v1138_v12 = vld [vmem:[%s1119_s28 + $0x10] sm:$0xff]  ;;  %s1189_s20 = scalar_lea.vmem [#allocation8], %s573_s30  ;;  %s1210_s24 = scalar_lea.hbm %s1271_s3, %s584_s18 }
  0x6c   : > { %646 = vmatpush3.bf16.msra.mxu0 %v645_v5  ;;  %v1135_v11 = vld [vmem:[%s1119_s28 + $0x8] sm:$0xff]  ;;  %v651_v14 = vpack.c.bf16 %v259_v9, %v258_v8  ;;  %v1143_v15 = vld [vmem:[%s1119_s28 + $0x18] sm:$0xff]  ;;  %v260_v16 = vld [vmem:[#allocation5 + $0x30] sm:$0xff]  ;;  %s472_s7 = sshll.u32 %s1189_s20, 4  ;;  %s459_s27 = scalar_lea.sflag [#allocation4], %s1113_s29  ;;  %s1212_s7 = int_to_ptr.vmem [resolvable:$true] %s472_s7 }
  0x6d   : > { %647 = vmatprep.subr.bf16.mxu0 %v909_v0  ;;  %v232_v13 = vadd.f32 %v1135_v11, %v1132_v10  ;;  %v261_v17 = vld [vmem:[#allocation5 + $0x38] sm:$0xff]  ;;  %v1148_v19 = vld [vmem:[%s1119_s28 + $0x20] sm:$0xff]  ;;  %v1152_v22 = vld [vmem:[%s1119_s28 + $0x28] sm:$0xff]  ;;  %s832_s22 = scalar_lea.vmem %s1212_s7, 2048  ;;  %p1285_p0 = scmp.ne.s32.totalorder %s1280_s6, 0 }
  0x6e   : > { %v654_v21 = vpack.c.bf16 %v261_v17, %v260_v16  ;;  %v262_v23 = vld [vmem:[#allocation5 + $0x40] sm:$0xff]  ;;  %v263_v24 = vld [vmem:[#allocation5 + $0x48] sm:$0xff]  ;;  %v1157_v26 = vld [vmem:[%s1119_s28 + $0x30] sm:$0xff]  ;;  %p833_p11 = scmp.ne.s32.totalorder %s1212_s7, %s832_s22  ;;  %s912_s5 = smov [#allocation8]  }
  0x6f   : > { %v233_v18 = vadd.f32 %v232_v13, %v1138_v12  ;;  %v657_v28 = vpack.c.bf16 %v263_v24, %v262_v23  ;;  %v1161_v29 = vld [vmem:[%s1119_s28 + $0x38] sm:$0xff]  ;;  %v264_v30 = vld [vmem:[#allocation5 + $0x50] sm:$0xff]  ;;  %v1166_v33 = vld [vmem:[%s1119_s28 + $0x40] sm:$0xff]  ;;  %v422_v13 = vlaneseq  ;;  %s836_s11 = sshll.u32 %s912_s5, 4  ;;  %s837_s11 = int_to_ptr.vmem [resolvable:$false] %s836_s11 }
  0x70   : > { %649 = vmatpush3.bf16.msra.mxu0 %v648_v7  ;;  %v265_v31 = vld [vmem:[#allocation5 + $0x58] sm:$0xff]  ;;  %v1170_v36 = vld [vmem:[%s1119_s28 + $0x48] sm:$0xff]  ;;  %v266_v37 = vld [vmem:[#allocation5 + $0x60] sm:$0xff]  ;;  %p834_p2 = pnand %p833_p11, %p1285_p0  ;;  %s838_s25 = scalar_lea.vmem %s837_s11, 4096 }
  0x71   : > { %650 = vmatprep.subr.bf16.mxu0 %v909_v0  ;;  %v234_v20 = vadd.f32 %v233_v18, %v1143_v15  ;;  %v660_v35 = vpack.c.bf16 %v265_v31, %v264_v30  ;;  %v267_v38 = vld [vmem:[#allocation5 + $0x68] sm:$0xff]  ;;  %v1175_v40 = vld [vmem:[%s1119_s28 + $0x50] sm:$0xff]  ;;  %v227_v43 = vld [vmem:[%s1119_s28 + $0x58] sm:$0xff]  ;;  %p839_p7 = scmp.lt.s32.totalorder %s1212_s7, %s837_s11  ;;  %p840_p9 = scmp.lt.s32.totalorder %s838_s25, %s832_s22 }
  0x72   : > { %v663_v42 = vpack.c.bf16 %v267_v38, %v266_v37  ;;  %v268_v44 = vld [vmem:[#allocation5 + $0x70] sm:$0xff]  ;;  %v269_v45 = vld [vmem:[#allocation5 + $0x78] sm:$0xff]  ;;  %v228_v47 = vld [vmem:[%s1119_s28 + $0x60] sm:$0xff]  ;;  %p835_p3 = pneg %p834_p2 }
  0x73   : > { %v235_v25 = vadd.f32 %v234_v20, %v1148_v19  ;;  %v666_v49 = vpack.c.bf16 %v269_v45, %v268_v44  ;;  %v229_v50 = vld [vmem:[%s1119_s28 + $0x68] sm:$0xff]  ;;  %v230_v52 = vld [vmem:[%s1119_s28 + $0x70] sm:$0xff]  ;;  %v231_v54 = vld [vmem:[%s1119_s28 + $0x78] sm:$0xff]  ;;  %p841_p12 = por %p840_p9, %p839_p7 }
  0x74   : > { %652 = vmatpush3.bf16.msra.mxu0 %v651_v14  ;;  %v341_v1 = vld [vmem:[#allocation7] sm:$0xff]  ;;  %v423_v14 = vshrl.u32 %v422_v13, 7 }
  0x75   : > { %653 = vmatprep.subr.bf16.mxu0 %v909_v0  ;;  %v236_v27 = vadd.f32 %v235_v25, %v1152_v22  ;;  %640 = vmatpush3.msra.mxu1 %v341_v1  ;;  %p842_p1 = pnand %p841_p12, %p835_p3 }
  0x76   : > { %v424_v16 = vsub.s32 0, %v423_v14 }
  0x77   : > { %v237_v32 = vadd.f32 %v236_v27, %v1157_v26 }
  0x78   : > { %655 = vmatpush3.bf16.msra.mxu0 %v654_v21 }
  0x79   : > { %656 = vmatprep.subr.bf16.mxu0 %v909_v0  ;;  %v238_v34 = vadd.f32 %v237_v32, %v1161_v29 }
  0x7b   : > { %v239_v39 = vadd.f32 %v238_v34, %v1166_v33 }
  0x7c   : > { %658 = vmatpush3.bf16.msra.mxu0 %v657_v28 }
  0x7d   : > { %659 = vmatprep.subr.bf16.mxu0 %v909_v0  ;;  %v240_v41 = vadd.f32 %v239_v39, %v1170_v36 }
  0x7f   : > { %v241_v46 = vadd.f32 %v240_v41, %v1175_v40 }
  0x80   : > { %661 = vmatpush3.bf16.msra.mxu0 %v660_v35 }
  0x81   : > { %662 = vmatprep.subr.bf16.mxu0 %v909_v0  ;;  %v242_v48 = vadd.f32 %v241_v46, %v227_v43 }
  0x83   : > { %v243_v51 = vadd.f32 %v242_v48, %v228_v47 }
  0x84   : > { %664 = vmatpush3.bf16.msra.mxu0 %v663_v42 }
  0x85   : > { %665 = vmatprep.subr.bf16.mxu0 %v909_v0  ;;  %v244_v53 = vadd.f32 %v243_v51, %v229_v50 }
  0x87   : > { %v245_v55 = vadd.f32 %v244_v53, %v230_v52 }
  0x88   : > { %667 = vmatpush3.bf16.msra.mxu0 %v666_v49 }
  0x89   : > { %v246_v56 = vadd.f32 %v245_v55, %v231_v54 }
  0x8b   : > { %v247_v57 = vrot.slane %v246_v56, 4 }
  0x8d   : > { %v248_v58 = vadd.f32 %v247_v57, %v246_v56 }
  0x8f   : > { %v249_v59 = vrot.slane %v248_v58, 2 }
  0x91   : > { %v250_v60 = vadd.f32 %v249_v59, %v248_v58 }
  0x93   : > { %v251_v61 = vrot.slane %v250_v60, 1 }
  0x95   : > { %v252_v62 = vadd.f32 %v251_v61, %v250_v60 }
  0x97   : > { %v253_v63 = vmul.f32 0.0078125, %v252_v62 }
  0x99   : > { %637 = vmatmul.mubr.f32.vlgmr.msra.gmra.mrb[0].mxu0 %v253_v63 }
 0x16c   : > { %v336_v2 = vpop.f32.mrb[0].mxu0 }
 0x16d   : > { %v340_v0 = vmax.f32 %v336_v2, 0.0  ;;  %v638_v3 = vpop.f32.mrb[1].mxu0 }
 0x16f   : > { %642 = vmatmul.mubr.msk.f32.vlgmr.msra.gmra.mrb[0].mxu1 %vm342_vm1, %v340_v0 }
 0x242   : > { %v412_v4 = vpop.f32.mrb[0].mxu1 }
 0x243   : > { %v416_v5 = vsub.f32 0.0, %v412_v4  ;;  %v643_v6 = vpop.f32.mrb[1].mxu1 }
 0x245   : > { %v417_v7 = vmul.f32 1.442695, %v416_v5 }
 0x247   : > { %742 = vpow2.f32 %v417_v7 }
 0x251   : > { %v743_v8 = vpop.eup %742 }
 0x252   : > { %v419_v9 = vadd.f32 1.0, %v743_v8 }
 0x254   : > { %744 = vrcp.f32 %v419_v9 }
 0x25e   : > { %v745_v17 = vpop.eup %744 }
 0x25f   : > { %v425_v18 = vrot.slane %v745_v17, %v424_v16 }
 0x261   : > { %v426_v20 = vmul.f32 %v425_v18, %v1132_v10  ;;  %v427_v21 = vmul.f32 %v425_v18, %v1135_v11  ;;  %v428_v23 = vmul.f32 %v425_v18, %v1138_v12  ;;  %v429_v24 = vmul.f32 %v425_v18, %v1143_v15 }
 0x262   : > { %v430_v25 = vmul.f32 %v425_v18, %v1148_v19  ;;  %v431_v27 = vmul.f32 %v425_v18, %v1152_v22  ;;  %v432_v28 = vmul.f32 %v425_v18, %v1157_v26  ;;  %v433_v30 = vmul.f32 %v425_v18, %v1161_v29 }
 0x263   : > { %v434_v31 = vmul.f32 %v425_v18, %v1166_v33  ;;  %v435_v10 = vmul.f32 %v425_v18, %v1170_v36  ;;  %v436_v11 = vmul.f32 %v425_v18, %v1175_v40  ;;  %v437_v12 = vmul.f32 %v425_v18, %v227_v43  ;;  %442 = vst [vmem:[%s1189_s20] sm:$0xff] %v426_v20 }
 0x264   : > { %443 = vst [vmem:[%s1189_s20 + $0x8] sm:$0xff] %v427_v21  ;;  %444 = vst [vmem:[%s1189_s20 + $0x10] sm:$0xff] %v428_v23  ;;  %v438_v15 = vmul.f32 %v425_v18, %v228_v47  ;;  %v439_v19 = vmul.f32 %v425_v18, %v229_v50  ;;  %v440_v22 = vmul.f32 %v425_v18, %v230_v52 }
 0x265   : > { %445 = vst [vmem:[%s1189_s20 + $0x18] sm:$0xff] %v429_v24  ;;  %v441_v26 = vmul.f32 %v425_v18, %v231_v54  ;;  %446 = vst [vmem:[%s1189_s20 + $0x20] sm:$0xff] %v430_v25 }
 0x266   : > { %447 = vst [vmem:[%s1189_s20 + $0x28] sm:$0xff] %v431_v27  ;;  %448 = vst [vmem:[%s1189_s20 + $0x30] sm:$0xff] %v432_v28 }
 0x267   : > { %449 = vst [vmem:[%s1189_s20 + $0x38] sm:$0xff] %v433_v30  ;;  %450 = vst [vmem:[%s1189_s20 + $0x40] sm:$0xff] %v434_v31 }
 0x268   : > { %451 = vst [vmem:[%s1189_s20 + $0x48] sm:$0xff] %v435_v10  ;;  %452 = vst [vmem:[%s1189_s20 + $0x50] sm:$0xff] %v436_v11 }
 0x269   : > { %453 = vst [vmem:[%s1189_s20 + $0x58] sm:$0xff] %v437_v12  ;;  %454 = vst [vmem:[%s1189_s20 + $0x60] sm:$0xff] %v438_v15 }
 0x26a   : > { %455 = vst [vmem:[%s1189_s20 + $0x68] sm:$0xff] %v439_v19  ;;  %456 = vst [vmem:[%s1189_s20 + $0x70] sm:$0xff] %v440_v22 }
 0x26b   : > { %457 = vst [vmem:[%s1189_s20 + $0x78] sm:$0xff] %v441_v26 }
 0x26c   : > { %845 = shalt.err (!%p842_p1)
}
 0x26d   : > { %s846_s10 = scalar_lea.hbm %s1210_s24, 2048  ;;  %s850_s26 = scalar_lea.hbm %s1271_s3, 4096 }
 0x26e   : > { %p847_p13 = scmp.ne.s32.totalorder %s1210_s24, %s846_s10  ;;  %p851_p4 = scmp.lt.u32.totalorder %s1210_s24, %s1271_s3 }
 0x26f   : > { %p852_p5 = scmp.lt.u32.totalorder %s850_s26, %s846_s10  ;;  %p854_p11 = scmp.lt.u32.totalorder %s846_s10, %s1210_s24 }
 0x270   : > { %p848_p6 = pnand %p847_p13, %p1285_p0 }
 0x271   : > { %p853_p8 = por %p852_p5, %p851_p4 }
 0x272   : > { %p849_p10 = pneg %p848_p6 }
 0x273   : > { %p855_p2 = por %p854_p11, %p853_p8 }
 0x275   : > { %p856_p3 = pnand %p855_p2, %p849_p10 }
 0x277   : > { %859 = shalt.err (!%p856_p3)
}
 0x278   : > { %s913_s28 = smov 128   ;;  %s914_s18 = smov 8  }
 0x279   : > { %678 = dma.vmem_to_hbm [thread:$0]  (%p1285_p0), %s1212_s7, 2048, %s1210_s24, %s459_s27, %s913_s28, %s913_s28, %s914_s18  }
 0x27a PF: > { %s487_s20 = sand.u32 1, %s890_s12   ;;  %p1286_p7 = scmp.ne.s32.totalorder %s1276_s19, 0 }
 0x27b   : > { %p1287_p9 = scmp.ge.s32.totalorder %s902_s15, 2  ;;  %s488_s16 = scalar_lea.sflag [#allocation4], %s487_s20 }
 0x27d   : > { %p692_p12 = pnand %p1287_p9, %p1286_p7 }
 0x27f   : > { %885 = dma.done.wait (!%p692_p12), %s488_s16, 2048  }
 0x280   : > { %887 = vsyncadd (!%p692_p12), %s488_s16, 4294965248  ;;  %p17_p1 = scmp.ge.s32.totalorder %s1048_s4, 4   ;;  %s1288_s12 = smov %s894_s13 }
 0x281   : > { %s1289_s13 = smov %s898_s14  ;;  %s1290_s14 = smov %s1064_s9 }
 0x282   : > { %s1291_s15 = smov %s1048_s4  ;;  %19 = sbr.rel (!%p17_p1) target bundleno = 6 (0x6), region = 85 }
 0x289   :  { %493 = vsyncpa [#allocation3], 1 }
 0x28a   :  { %495 = vsyncpa [#allocation3 + $0x1], 1 }
 0x28b   :  { %496 = vsyncpa [#allocation6], 1 }
 0x28c   :  { %497 = vsyncpa [#allocation4], 1 }
 0x28d   :  { %499 = vsyncpa [#allocation4 + $0x1], 1 }

</bundles_post_ra>
